<compile_context>
chip_gen: v7x
topology: tpu7x:2x2x1
jax: 0.10.0
libtpu: 0.0.40
codegen_flags: <defaults>
</compile_context>

<pallas_src>
import functools

import jax
import jax.numpy as jnp
from jax import lax
from jax.experimental import pallas as pl
from jax.experimental.pallas import tpu as pltpu

# ---------------- small synthetic config (lane/sublane aligned) ----------------
B = 32                      # batch (whole batch = one MXU tile at this scale)
IMG_C, IMG_H, IMG_W = 3, 16, 16
SEQ = 8                     # text sequence length
VOCAB = 64
IMAGE_EMBEDDING = 256       # stands in for CFG.image_embedding (2048 for ResNet50)
TEXT_EMBEDDING = 128        # stands in for CFG.text_embedding (768 for DistilBERT)
PROJ_DIM = 128              # ProjectionHead projection_dim (256 in the original CFG)
TEMPERATURE = 1.0           # CFG.temperature
LN_EPS = 1e-5               # PyTorch nn.LayerNorm default eps

# dot_general contracting the last dim of both operands (replaces `a @ b.T`).
_CONTRACT_LAST = (((1,), (1,)), ((), ()))


# ---------------- shared math (used inside the kernel AND by the reference) ----------------
def _gelu(x):
    # TODO(synk): PyTorch nn.GELU() defaults to the exact erf form; tanh approximation
    # used because erf has no guaranteed Mosaic lowering.
    c = jnp.sqrt(2.0 / jnp.pi).astype(x.dtype)
    return 0.5 * x * (1.0 + jnp.tanh(c * (x + 0.044715 * x * x * x)))


def _projection_head(x, w1, w2, packed_vec):
    # packed_vec rows: 0=b1, 1=b2, 2=gamma (LN weight), 3=beta (LN bias); rows 4-7 pad.
    b1 = packed_vec[0:1]
    b2 = packed_vec[1:2]
    gamma = packed_vec[2:3]
    beta = packed_vec[3:4]
    # Linear -> GELU -> Linear -> (dropout=identity, eval) -> residual -> LayerNorm.
    # Matmuls bf16-in / f32-accumulate; all element-wise math in f32.
    projected = jnp.dot(x, w1, preferred_element_type=jnp.float32) + b1
    h = _gelu(projected)
    h = jnp.dot(h.astype(w2.dtype), w2, preferred_element_type=jnp.float32) + b2
    h = h + projected
    mean = jnp.mean(h, axis=-1, keepdims=True)
    var = jnp.mean((h - mean) ** 2, axis=-1, keepdims=True)
    h = (h - mean) * lax.rsqrt(var + LN_EPS)
    return h * gamma + beta                       # f32 (B, PROJ_DIM)


def _clip_loss_math(img_emb, txt_emb, *, inv_temp, half_temp, inv_2b, recip):
    # logits = txt @ img.T ; sims = emb @ emb.T -- dot_general over the shared
    # feature axis so no transpose is materialized before the MXU.
    logits = lax.dot_general(txt_emb, img_emb, _CONTRACT_LAST,
                             preferred_element_type=jnp.float32) * inv_temp
    img_sim = lax.dot_general(img_emb, img_emb, _CONTRACT_LAST,
                              preferred_element_type=jnp.float32)
    txt_sim = lax.dot_general(txt_emb, txt_emb, _CONTRACT_LAST,
                              preferred_element_type=jnp.float32)

    # targets = softmax((img_sim + txt_sim) / 2 * temperature, dim=-1)
    t = (img_sim + txt_sim) * half_temp
    t = t - jnp.max(t, axis=-1, keepdims=True)
    e = jnp.exp(t)
    targets = e * recip(jnp.sum(e, axis=-1, keepdims=True))

    # texts_loss uses the row-wise log-softmax; images_loss uses the column-wise
    # log-softmax of the SAME logits matrix (== log_softmax(logits.T) without
    # building the transpose). Summed before the multiply to drop one BxB temp.
    sr = logits - jnp.max(logits, axis=-1, keepdims=True)
    sc = logits - jnp.max(logits, axis=0, keepdims=True)
    lsm_sum = (sr - jnp.log(jnp.sum(jnp.exp(sr), axis=-1, keepdims=True))
               + sc - jnp.log(jnp.sum(jnp.exp(sc), axis=0, keepdims=True)))

    # loss.mean() == sum_ij -targets_ij * (lsm_rows + lsm_cols)_ij / (2B)
    per_pair = -targets * lsm_sum
    total = jnp.sum(jnp.sum(per_pair, axis=1, keepdims=True), axis=0, keepdims=True)
    return total * inv_2b                                                   # (1, 1)


# ---------------- fused Pallas kernel: both projection heads + CLIP loss ----------------
# TODO(synk): at B=32 the (32,32) logits/targets fill only 32 of 128 lanes per vreg;
# at production batch sizes pad B to a multiple of 128 and row-tile the loss
# (column log-softmax becomes a carried cross-tile reduction in VMEM scratch).
def clip_fused_kernel(img_feat_ref, txt_feat_ref,
                      wi1_ref, wi2_ref, pvi_ref,
                      wt1_ref, wt2_ref, pvt_ref,
                      loss_ref, *, inv_temp, half_temp, inv_2b):
    img_emb = _projection_head(img_feat_ref[...], wi1_ref[...], wi2_ref[...],
                               pvi_ref[...])
    txt_emb = _projection_head(txt_feat_ref[...], wt1_ref[...], wt2_ref[...],
                               pvt_ref[...])
    # Embeddings stay f32 in VMEM -- never round-trip through HBM / bf16.
    loss_ref[...] = _clip_loss_math(
        img_emb, txt_emb,
        inv_temp=inv_temp, half_temp=half_temp, inv_2b=inv_2b,
        recip=lambda x: pl.reciprocal(x, approx=True))


def clip_forward_pallas(img_feat, txt_feat, p):
    batch = img_feat.shape[0]
    kernel = functools.partial(
        clip_fused_kernel,
        inv_temp=1.0 / TEMPERATURE,        # folded compile-time scalar
        half_temp=0.5 * TEMPERATURE,       # folded compile-time scalar
        inv_2b=1.0 / (2.0 * batch))        # folded compile-time scalar
    vmem = pl.BlockSpec(memory_space=pltpu.MemorySpace.VMEM)
    out = pl.pallas_call(
        kernel,
        out_shape=jax.ShapeDtypeStruct((1, 1), jnp.float32),
        in_specs=[vmem] * 8,
        out_specs=vmem,
        compiler_params=pltpu.CompilerParams(vmem_limit_bytes=32 * 1024 * 1024),
    )(img_feat, txt_feat,
      p["wi1"], p["wi2"], p["pvi"],
      p["wt1"], p["wt2"], p["pvt"])
    return out[0, 0]


# ---------------- stand-in encoders (plain JAX glue) ----------------
def image_encoder(image, w, b):
    # TODO(synk): real ImageEncoder is a pretrained timm ResNet50; stand-in = global
    # average pool over NCHW spatial dims followed by a linear layer to IMAGE_EMBEDDING.
    pooled = jnp.mean(image, axis=(2, 3))            # (B, C)
    return pooled @ w + b                            # (B, IMAGE_EMBEDDING)


def text_encoder(input_ids, attention_mask, emb_table):
    # TODO(synk): real TextEncoder is pretrained DistilBERT (CLS token); stand-in =
    # masked mean of token embeddings to TEXT_EMBEDDING.
    tok = emb_table[input_ids]                       # (B, L, TEXT_EMBEDDING)
    mask = attention_mask[..., None].astype(jnp.float32)
    return jnp.sum(tok * mask, axis=1) / jnp.maximum(jnp.sum(mask, axis=1), 1.0)


# ---------------- pure-JAX reference (same math, exact reciprocal, no Pallas) ----------------
def clip_forward_reference(img_feat, txt_feat, p):
    img_emb = _projection_head(img_feat, p["wi1"], p["wi2"], p["pvi"])
    txt_emb = _projection_head(txt_feat, p["wt1"], p["wt2"], p["pvt"])
    loss = _clip_loss_math(img_emb, txt_emb,
                           inv_temp=1.0 / TEMPERATURE,
                           half_temp=0.5 * TEMPERATURE,
                           inv_2b=1.0 / (2.0 * img_emb.shape[0]),
                           recip=lambda x: 1.0 / x)
    return loss[0, 0]


# ---------------- parameter init (deterministic) ----------------
def _pack_vectors(b1, b2, gamma, beta, proj_dim):
    # One (8, PROJ_DIM)-aligned f32 tile: rows 0=b1, 1=b2, 2=gamma, 3=beta, 4-7 pad.
    packed = jnp.zeros((8, proj_dim), jnp.float32)
    return packed.at[0].set(b1).at[1].set(b2).at[2].set(gamma).at[3].set(beta)


def init_params(key):
    ks = jax.random.split(key, 12)
    s = 0.05
    bf16 = jnp.bfloat16
    pvi = _pack_vectors(
        s * jax.random.normal(ks[1], (PROJ_DIM,), jnp.float32),
        s * jax.random.normal(ks[3], (PROJ_DIM,), jnp.float32),
        jnp.ones((PROJ_DIM,), jnp.float32),
        jnp.zeros((PROJ_DIM,), jnp.float32),
        PROJ_DIM)
    pvt = _pack_vectors(
        s * jax.random.normal(ks[5], (PROJ_DIM,), jnp.float32),
        s * jax.random.normal(ks[7], (PROJ_DIM,), jnp.float32),
        jnp.ones((PROJ_DIM,), jnp.float32),
        jnp.zeros((PROJ_DIM,), jnp.float32),
        PROJ_DIM)
    return {
        # image projection head (weight matrices bf16 for MXU, packed vectors f32)
        "wi1": (s * jax.random.normal(ks[0], (IMAGE_EMBEDDING, PROJ_DIM), jnp.float32)).astype(bf16),
        "wi2": (s * jax.random.normal(ks[2], (PROJ_DIM, PROJ_DIM), jnp.float32)).astype(bf16),
        "pvi": pvi,
        # text projection head
        "wt1": (s * jax.random.normal(ks[4], (TEXT_EMBEDDING, PROJ_DIM), jnp.float32)).astype(bf16),
        "wt2": (s * jax.random.normal(ks[6], (PROJ_DIM, PROJ_DIM), jnp.float32)).astype(bf16),
        "pvt": pvt,
        # stand-in encoders
        "enc_img_w": s * jax.random.normal(ks[8], (IMG_C, IMAGE_EMBEDDING), jnp.float32),
        "enc_img_b": s * jax.random.normal(ks[9], (IMAGE_EMBEDDING,), jnp.float32),
        "emb_table": s * jax.random.normal(ks[10], (VOCAB, TEXT_EMBEDDING), jnp.float32),
    }


if __name__ == "__main__":
    key = jax.random.PRNGKey(0)
    k_param, k_img, k_ids = jax.random.split(key, 3)

    params = init_params(k_param)

    # batch = {'image', 'input_ids', 'attention_mask'}
    image = jax.random.normal(k_img, (B, IMG_C, IMG_H, IMG_W), jnp.float32)   # NCHW
    input_ids = jax.random.randint(k_ids, (B, SEQ), 0, VOCAB)
    attention_mask = jnp.ones((B, SEQ), jnp.int32)

    # Encoder features cast to bf16 at the pallas_call boundary (halves DMA bytes,
    # native MXU dtype); the reference consumes the identical bf16 features.
    img_feat = image_encoder(image, params["enc_img_w"], params["enc_img_b"]).astype(jnp.bfloat16)
    txt_feat = text_encoder(input_ids, attention_mask, params["emb_table"]).astype(jnp.bfloat16)

    loss = clip_forward_pallas(img_feat, txt_feat, params)
    loss = jax.block_until_ready(loss)

    ref = clip_forward_reference(img_feat, txt_feat, params)
    assert jnp.isfinite(loss), f"non-finite loss: {loss}"
    assert jnp.allclose(loss, ref, rtol=5e-3, atol=1e-3), (float(loss), float(ref))

    print("KERNEL_OK")
</pallas_src>

<mosaic_0001>
module attributes {stable_mosaic.version = 11 : i64} {
  func.func @clip_fused_kernel(%arg0: memref<32x256xbf16, #tpu.memory_space<vmem>>, %arg1: memref<32x128xbf16, #tpu.memory_space<vmem>>, %arg2: memref<256x128xbf16, #tpu.memory_space<vmem>>, %arg3: memref<128x128xbf16, #tpu.memory_space<vmem>>, %arg4: memref<8x128xf32, #tpu.memory_space<vmem>>, %arg5: memref<128x128xbf16, #tpu.memory_space<vmem>>, %arg6: memref<128x128xbf16, #tpu.memory_space<vmem>>, %arg7: memref<8x128xf32, #tpu.memory_space<vmem>>, %arg8: memref<1x1xf32, #tpu.memory_space<vmem>>) attributes {dimension_semantics = [], scalar_prefetch = 0 : i64, scratch_operands = 0 : i64, tpu.core_type = #tpu.core_type<tc>} {
    %c0 = arith.constant 0 : index
    %c0_0 = arith.constant 0 : index
    %0 = vector.load %arg0[%c0, %c0_0] : memref<32x256xbf16, #tpu.memory_space<vmem>>, vector<32x256xbf16>
    %c0_1 = arith.constant 0 : index
    %c0_2 = arith.constant 0 : index
    %1 = vector.load %arg2[%c0_1, %c0_2] : memref<256x128xbf16, #tpu.memory_space<vmem>>, vector<256x128xbf16>
    %c0_3 = arith.constant 0 : index
    %c0_4 = arith.constant 0 : index
    %2 = vector.load %arg3[%c0_3, %c0_4] : memref<128x128xbf16, #tpu.memory_space<vmem>>, vector<128x128xbf16>
    %c0_5 = arith.constant 0 : index
    %c0_6 = arith.constant 0 : index
    %3 = vector.load %arg4[%c0_5, %c0_6] : memref<8x128xf32, #tpu.memory_space<vmem>>, vector<8x128xf32>
    %4 = vector.extract_strided_slice %3 {offsets = [0, 0], sizes = [1, 128], strides = [1, 1]} : vector<8x128xf32> to vector<1x128xf32>
    %5 = vector.extract_strided_slice %3 {offsets = [1, 0], sizes = [1, 128], strides = [1, 1]} : vector<8x128xf32> to vector<1x128xf32>
    %6 = vector.extract_strided_slice %3 {offsets = [2, 0], sizes = [1, 128], strides = [1, 1]} : vector<8x128xf32> to vector<1x128xf32>
    %7 = vector.extract_strided_slice %3 {offsets = [3, 0], sizes = [1, 128], strides = [1, 1]} : vector<8x128xf32> to vector<1x128xf32>
    %cst = arith.constant dense<0.000000e+00> : vector<32x128xf32>
    %8 = tpu.matmul %0, %1, %cst {dimension_numbers = #tpu.dot_dimension_numbers<[1], [0], [0], [1], [0, 0, 1, 1], [], []>} : vector<32x256xbf16>, vector<256x128xbf16>, vector<32x128xf32> -> vector<32x128xf32>
    %9 = vector.broadcast %4 : vector<1x128xf32> to vector<32x128xf32>
    %10 = arith.addf %8, %9 : vector<32x128xf32>
    %cst_7 = arith.constant 0.636619746 : f32
    %11 = math.sqrt %cst_7 : f32
    %cst_8 = arith.constant 5.000000e-01 : f32
    %12 = vector.broadcast %cst_8 : f32 to vector<32x128xf32>
    %13 = arith.mulf %12, %10 : vector<32x128xf32>
    %cst_9 = arith.constant 4.471500e-02 : f32
    %14 = vector.broadcast %cst_9 : f32 to vector<32x128xf32>
    %15 = arith.mulf %14, %10 : vector<32x128xf32>
    %16 = arith.mulf %15, %10 : vector<32x128xf32>
    %17 = arith.mulf %16, %10 : vector<32x128xf32>
    %18 = arith.addf %10, %17 : vector<32x128xf32>
    %19 = vector.broadcast %11 : f32 to vector<32x128xf32>
    %20 = arith.mulf %19, %18 : vector<32x128xf32>
    %21 = math.tanh %20 : vector<32x128xf32>
    %cst_10 = arith.constant 1.000000e+00 : f32
    %22 = vector.broadcast %cst_10 : f32 to vector<32x128xf32>
    %23 = arith.addf %22, %21 : vector<32x128xf32>
    %24 = arith.mulf %13, %23 : vector<32x128xf32>
    %25 = arith.truncf %24 : vector<32x128xf32> to vector<32x128xbf16>
    %cst_11 = arith.constant dense<0.000000e+00> : vector<32x128xf32>
    %26 = tpu.matmul %25, %2, %cst_11 {dimension_numbers = #tpu.dot_dimension_numbers<[1], [0], [0], [1], [0, 0, 1, 1], [], []>} : vector<32x128xbf16>, vector<128x128xbf16>, vector<32x128xf32> -> vector<32x128xf32>
    %27 = vector.broadcast %5 : vector<1x128xf32> to vector<32x128xf32>
    %28 = arith.addf %26, %27 : vector<32x128xf32>
    %29 = arith.addf %28, %10 : vector<32x128xf32>
    %cst_12 = arith.constant dense<0.000000e+00> : vector<32xf32>
    %30 = vector.multi_reduction <add>, %29, %cst_12 [1] : vector<32x128xf32> to vector<32xf32>
    %31 = vector.shape_cast %30 : vector<32xf32> to vector<32x1xf32>
    %cst_13 = arith.constant 1.280000e+02 : f32
    %32 = vector.broadcast %cst_13 : f32 to vector<32x1xf32>
    %33 = arith.divf %31, %32 : vector<32x1xf32>
    %34 = vector.broadcast %33 : vector<32x1xf32> to vector<32x128xf32>
    %35 = arith.subf %29, %34 : vector<32x128xf32>
    %36 = arith.mulf %35, %35 : vector<32x128xf32>
    %cst_14 = arith.constant dense<0.000000e+00> : vector<32xf32>
    %37 = vector.multi_reduction <add>, %36, %cst_14 [1] : vector<32x128xf32> to vector<32xf32>
    %38 = vector.shape_cast %37 : vector<32xf32> to vector<32x1xf32>
    %cst_15 = arith.constant 1.280000e+02 : f32
    %39 = vector.broadcast %cst_15 : f32 to vector<32x1xf32>
    %40 = arith.divf %38, %39 : vector<32x1xf32>
    %41 = vector.broadcast %33 : vector<32x1xf32> to vector<32x128xf32>
    %42 = arith.subf %29, %41 : vector<32x128xf32>
    %cst_16 = arith.constant 9.99999974E-6 : f32
    %43 = vector.broadcast %cst_16 : f32 to vector<32x1xf32>
    %44 = arith.addf %40, %43 : vector<32x1xf32>
    %45 = math.rsqrt %44 : vector<32x1xf32>
    %46 = vector.broadcast %45 : vector<32x1xf32> to vector<32x128xf32>
    %47 = arith.mulf %42, %46 : vector<32x128xf32>
    %48 = vector.broadcast %6 : vector<1x128xf32> to vector<32x128xf32>
    %49 = arith.mulf %47, %48 : vector<32x128xf32>
    %50 = vector.broadcast %7 : vector<1x128xf32> to vector<32x128xf32>
    %51 = arith.addf %49, %50 : vector<32x128xf32>
    %c0_17 = arith.constant 0 : index
    %c0_18 = arith.constant 0 : index
    %52 = vector.load %arg1[%c0_17, %c0_18] : memref<32x128xbf16, #tpu.memory_space<vmem>>, vector<32x128xbf16>
    %c0_19 = arith.constant 0 : index
    %c0_20 = arith.constant 0 : index
    %53 = vector.load %arg5[%c0_19, %c0_20] : memref<128x128xbf16, #tpu.memory_space<vmem>>, vector<128x128xbf16>
    %c0_21 = arith.constant 0 : index
    %c0_22 = arith.constant 0 : index
    %54 = vector.load %arg6[%c0_21, %c0_22] : memref<128x128xbf16, #tpu.memory_space<vmem>>, vector<128x128xbf16>
    %c0_23 = arith.constant 0 : index
    %c0_24 = arith.constant 0 : index
    %55 = vector.load %arg7[%c0_23, %c0_24] : memref<8x128xf32, #tpu.memory_space<vmem>>, vector<8x128xf32>
    %56 = vector.extract_strided_slice %55 {offsets = [0, 0], sizes = [1, 128], strides = [1, 1]} : vector<8x128xf32> to vector<1x128xf32>
    %57 = vector.extract_strided_slice %55 {offsets = [1, 0], sizes = [1, 128], strides = [1, 1]} : vector<8x128xf32> to vector<1x128xf32>
    %58 = vector.extract_strided_slice %55 {offsets = [2, 0], sizes = [1, 128], strides = [1, 1]} : vector<8x128xf32> to vector<1x128xf32>
    %59 = vector.extract_strided_slice %55 {offsets = [3, 0], sizes = [1, 128], strides = [1, 1]} : vector<8x128xf32> to vector<1x128xf32>
    %cst_25 = arith.constant dense<0.000000e+00> : vector<32x128xf32>
    %60 = tpu.matmul %52, %53, %cst_25 {dimension_numbers = #tpu.dot_dimension_numbers<[1], [0], [0], [1], [0, 0, 1, 1], [], []>} : vector<32x128xbf16>, vector<128x128xbf16>, vector<32x128xf32> -> vector<32x128xf32>
    %61 = vector.broadcast %56 : vector<1x128xf32> to vector<32x128xf32>
    %62 = arith.addf %60, %61 : vector<32x128xf32>
    %cst_26 = arith.constant 0.636619746 : f32
    %63 = math.sqrt %cst_26 : f32
    %cst_27 = arith.constant 5.000000e-01 : f32
    %64 = vector.broadcast %cst_27 : f32 to vector<32x128xf32>
    %65 = arith.mulf %64, %62 : vector<32x128xf32>
    %cst_28 = arith.constant 4.471500e-02 : f32
    %66 = vector.broadcast %cst_28 : f32 to vector<32x128xf32>
    %67 = arith.mulf %66, %62 : vector<32x128xf32>
    %68 = arith.mulf %67, %62 : vector<32x128xf32>
    %69 = arith.mulf %68, %62 : vector<32x128xf32>
    %70 = arith.addf %62, %69 : vector<32x128xf32>
    %71 = vector.broadcast %63 : f32 to vector<32x128xf32>
    %72 = arith.mulf %71, %70 : vector<32x128xf32>
    %73 = math.tanh %72 : vector<32x128xf32>
    %cst_29 = arith.constant 1.000000e+00 : f32
    %74 = vector.broadcast %cst_29 : f32 to vector<32x128xf32>
    %75 = arith.addf %74, %73 : vector<32x128xf32>
    %76 = arith.mulf %65, %75 : vector<32x128xf32>
    %77 = arith.truncf %76 : vector<32x128xf32> to vector<32x128xbf16>
    %cst_30 = arith.constant dense<0.000000e+00> : vector<32x128xf32>
    %78 = tpu.matmul %77, %54, %cst_30 {dimension_numbers = #tpu.dot_dimension_numbers<[1], [0], [0], [1], [0, 0, 1, 1], [], []>} : vector<32x128xbf16>, vector<128x128xbf16>, vector<32x128xf32> -> vector<32x128xf32>
    %79 = vector.broadcast %57 : vector<1x128xf32> to vector<32x128xf32>
    %80 = arith.addf %78, %79 : vector<32x128xf32>
    %81 = arith.addf %80, %62 : vector<32x128xf32>
    %cst_31 = arith.constant dense<0.000000e+00> : vector<32xf32>
    %82 = vector.multi_reduction <add>, %81, %cst_31 [1] : vector<32x128xf32> to vector<32xf32>
    %83 = vector.shape_cast %82 : vector<32xf32> to vector<32x1xf32>
    %cst_32 = arith.constant 1.280000e+02 : f32
    %84 = vector.broadcast %cst_32 : f32 to vector<32x1xf32>
    %85 = arith.divf %83, %84 : vector<32x1xf32>
    %86 = vector.broadcast %85 : vector<32x1xf32> to vector<32x128xf32>
    %87 = arith.subf %81, %86 : vector<32x128xf32>
    %88 = arith.mulf %87, %87 : vector<32x128xf32>
    %cst_33 = arith.constant dense<0.000000e+00> : vector<32xf32>
    %89 = vector.multi_reduction <add>, %88, %cst_33 [1] : vector<32x128xf32> to vector<32xf32>
    %90 = vector.shape_cast %89 : vector<32xf32> to vector<32x1xf32>
    %cst_34 = arith.constant 1.280000e+02 : f32
    %91 = vector.broadcast %cst_34 : f32 to vector<32x1xf32>
    %92 = arith.divf %90, %91 : vector<32x1xf32>
    %93 = vector.broadcast %85 : vector<32x1xf32> to vector<32x128xf32>
    %94 = arith.subf %81, %93 : vector<32x128xf32>
    %cst_35 = arith.constant 9.99999974E-6 : f32
    %95 = vector.broadcast %cst_35 : f32 to vector<32x1xf32>
    %96 = arith.addf %92, %95 : vector<32x1xf32>
    %97 = math.rsqrt %96 : vector<32x1xf32>
    %98 = vector.broadcast %97 : vector<32x1xf32> to vector<32x128xf32>
    %99 = arith.mulf %94, %98 : vector<32x128xf32>
    %100 = vector.broadcast %58 : vector<1x128xf32> to vector<32x128xf32>
    %101 = arith.mulf %99, %100 : vector<32x128xf32>
    %102 = vector.broadcast %59 : vector<1x128xf32> to vector<32x128xf32>
    %103 = arith.addf %101, %102 : vector<32x128xf32>
    %cst_36 = arith.constant dense<0.000000e+00> : vector<32x32xf32>
    %104 = tpu.matmul %103, %51, %cst_36 {dimension_numbers = #tpu.dot_dimension_numbers<[1], [1], [0], [0], [0, 0, 1, 0], [], []>} : vector<32x128xf32>, vector<32x128xf32>, vector<32x32xf32> -> vector<32x32xf32>
    %cst_37 = arith.constant 1.000000e+00 : f32
    %105 = vector.broadcast %cst_37 : f32 to vector<32x32xf32>
    %106 = arith.mulf %104, %105 : vector<32x32xf32>
    %cst_38 = arith.constant dense<0.000000e+00> : vector<32x32xf32>
    %107 = tpu.matmul %51, %51, %cst_38 {dimension_numbers = #tpu.dot_dimension_numbers<[1], [1], [0], [0], [0, 0, 1, 0], [], []>} : vector<32x128xf32>, vector<32x128xf32>, vector<32x32xf32> -> vector<32x32xf32>
    %cst_39 = arith.constant dense<0.000000e+00> : vector<32x32xf32>
    %108 = tpu.matmul %103, %103, %cst_39 {dimension_numbers = #tpu.dot_dimension_numbers<[1], [1], [0], [0], [0, 0, 1, 0], [], []>} : vector<32x128xf32>, vector<32x128xf32>, vector<32x32xf32> -> vector<32x32xf32>
    %109 = arith.addf %107, %108 : vector<32x32xf32>
    %cst_40 = arith.constant 5.000000e-01 : f32
    %110 = vector.broadcast %cst_40 : f32 to vector<32x32xf32>
    %111 = arith.mulf %109, %110 : vector<32x32xf32>
    %cst_41 = arith.constant dense<0xFF800000> : vector<32xf32>
    %112 = vector.multi_reduction <maximumf>, %111, %cst_41 [1] : vector<32x32xf32> to vector<32xf32>
    %113 = vector.shape_cast %112 : vector<32xf32> to vector<32x1xf32>
    %114 = vector.broadcast %113 : vector<32x1xf32> to vector<32x32xf32>
    %115 = arith.subf %111, %114 : vector<32x32xf32>
    %116 = math.exp %115 : vector<32x32xf32>
    %cst_42 = arith.constant dense<0.000000e+00> : vector<32xf32>
    %117 = vector.multi_reduction <add>, %116, %cst_42 [1] : vector<32x32xf32> to vector<32xf32>
    %118 = vector.shape_cast %117 : vector<32xf32> to vector<32x1xf32>
    %119 = tpu.reciprocal %118 {approx = true} : vector<32x1xf32> -> vector<32x1xf32>
    %120 = vector.broadcast %119 : vector<32x1xf32> to vector<32x32xf32>
    %121 = arith.mulf %116, %120 : vector<32x32xf32>
    %cst_43 = arith.constant dense<0xFF800000> : vector<32xf32>
    %122 = vector.multi_reduction <maximumf>, %106, %cst_43 [1] : vector<32x32xf32> to vector<32xf32>
    %123 = vector.shape_cast %122 : vector<32xf32> to vector<32x1xf32>
    %124 = vector.broadcast %123 : vector<32x1xf32> to vector<32x32xf32>
    %125 = arith.subf %106, %124 : vector<32x32xf32>
    %cst_44 = arith.constant dense<0xFF800000> : vector<32xf32>
    %126 = vector.multi_reduction <maximumf>, %106, %cst_44 [0] : vector<32x32xf32> to vector<32xf32>
    %127 = vector.shape_cast %126 : vector<32xf32> to vector<1x32xf32>
    %128 = vector.broadcast %127 : vector<1x32xf32> to vector<32x32xf32>
    %129 = arith.subf %106, %128 : vector<32x32xf32>
    %130 = math.exp %125 : vector<32x32xf32>
    %cst_45 = arith.constant dense<0.000000e+00> : vector<32xf32>
    %131 = vector.multi_reduction <add>, %130, %cst_45 [1] : vector<32x32xf32> to vector<32xf32>
    %132 = vector.shape_cast %131 : vector<32xf32> to vector<32x1xf32>
    %133 = math.log %132 : vector<32x1xf32>
    %134 = vector.broadcast %133 : vector<32x1xf32> to vector<32x32xf32>
    %135 = arith.subf %125, %134 : vector<32x32xf32>
    %136 = arith.addf %135, %129 : vector<32x32xf32>
    %137 = math.exp %129 : vector<32x32xf32>
    %cst_46 = arith.constant dense<0.000000e+00> : vector<32xf32>
    %138 = vector.multi_reduction <add>, %137, %cst_46 [0] : vector<32x32xf32> to vector<32xf32>
    %139 = vector.shape_cast %138 : vector<32xf32> to vector<1x32xf32>
    %140 = math.log %139 : vector<1x32xf32>
    %141 = vector.broadcast %140 : vector<1x32xf32> to vector<32x32xf32>
    %142 = arith.subf %136, %141 : vector<32x32xf32>
    %cst_47 = arith.constant 0.000000e+00 : f32
    %143 = vector.broadcast %cst_47 : f32 to vector<32x32xf32>
    %144 = arith.subf %143, %121 : vector<32x32xf32>
    %145 = arith.mulf %144, %142 : vector<32x32xf32>
    %cst_48 = arith.constant dense<0.000000e+00> : vector<32xf32>
    %146 = vector.multi_reduction <add>, %145, %cst_48 [1] : vector<32x32xf32> to vector<32xf32>
    %147 = vector.shape_cast %146 : vector<32xf32> to vector<32x1xf32>
    %cst_49 = arith.constant dense<0.000000e+00> : vector<1xf32>
    %148 = vector.multi_reduction <add>, %147, %cst_49 [0] : vector<32x1xf32> to vector<1xf32>
    %149 = vector.shape_cast %148 : vector<1xf32> to vector<1x1xf32>
    %cst_50 = arith.constant 1.562500e-02 : f32
    %150 = vector.broadcast %cst_50 : f32 to vector<1x1xf32>
    %151 = arith.mulf %149, %150 : vector<1x1xf32>
    %c0_51 = arith.constant 0 : index
    %c0_52 = arith.constant 0 : index
    %152 = vector.load %arg8[%c0_51, %c0_52] : memref<1x1xf32, #tpu.memory_space<vmem>>, vector<1x1xf32>
    tpu.vector_store %arg8[%c0_51, %c0_52], %151 {strides = array<i32>} : memref<1x1xf32, #tpu.memory_space<vmem>>, vector<1x1xf32>,
    return
  }
}

</mosaic_0001>

<bundles_post_ra>
// kernel: tpu_custom_call.1
= control target key start
LH: loop header
LB: loop body
LE: loop exit
PB: predicated region body
PF: predicated region fallthrough
CT: control target
= control target key end

     0   :  { %13 = vsyncpa [#allocation3], 0  ;;  %s2282_s0 = inlined_call_operand.hbm [shape: bf16[32,256], index: 0, kind: input, shape index: {}]   ;;  %s2283_s1 = inlined_call_operand.hbm [shape: bf16[32,128], index: 1, kind: input, shape index: {}]   ;;  %s2284_s2 = inlined_call_operand.hbm [shape: bf16[256,128], index: 2, kind: input, shape index: {}]   ;;  %s2285_s3 = inlined_call_operand.hbm [shape: bf16[128,128], index: 3, kind: input, shape index: {}]   ;;  %s2286_s4 = inlined_call_operand.vmem [shape: f32[8,128], index: 4, kind: input, shape index: {}]   ;;  %s2287_s5 = inlined_call_operand.hbm [shape: bf16[128,128], index: 5, kind: input, shape index: {}]   ;;  %s2288_s6 = inlined_call_operand.hbm [shape: bf16[128,128], index: 6, kind: input, shape index: {}]   ;;  %s2289_s7 = inlined_call_operand.vmem [shape: f32[8,128], index: 7, kind: input, shape index: {}]   ;;  %s2290_s8 = inlined_call_operand.hbm [shape: f32[1,1], index: 8, kind: output, shape index: {}]  }
   0x1   :  { %14 = vsyncpa [#allocation6], 0 }
   0x2   :  { %15 = vsyncpa [#allocation9], 0 }
   0x3   :  { %16 = vsyncpa [#allocation12], 0 }
   0x4   :  { %17 = vsyncpa [#allocation4], 0  ;;  %s1897_s27 = smov [#allocation5]   ;;  %s1733_s9 = scalar_lea.hbm %s2283_s1, 256 }
   0x5   :  { %s35_s28 = sshll.u32 %s1897_s27, 4  ;;  %p1734_p0 = scmp.ne.s32.totalorder %s2283_s1, %s1733_s9  ;;  %s36_s28 = int_to_ptr.vmem [resolvable:$true] %s35_s28 }
   0x6   :  { %p1737_p1 = scmp.lt.u32.totalorder %s1733_s9, %s2283_s1 }
   0x8   :  { %p1739_p2 = pnand %p1737_p1, %p1734_p0 }
   0xa   :  { %1742 = shalt.err (!%p1739_p2)
}
   0xb   :  { %s1743_s14 = scalar_lea.vmem %s36_s28, 256  ;;  %p1748_p4 = scmp.lt.s32.totalorder %s36_s28, %s36_s28 }
   0xc   :  { %p1744_p3 = scmp.ne.s32.totalorder %s36_s28, %s1743_s14  ;;  %p1749_p5 = scmp.lt.s32.totalorder %s1743_s14, %s1743_s14 }
   0xe   :  { %p1750_p6 = por %p1749_p5, %p1748_p4 }
  0x10   :  { %p1751_p7 = pnand %p1750_p6, %p1744_p3 }
  0x12   :  { %1754 = shalt.err (!%p1751_p7)
}
  0x13   :  { %s1898_s15 = smov 64   ;;  %s1899_s16 = smov 4  }
  0x14   :  { %41 = dma.hbm_to_vmem [thread:$0]  %s2283_s1, 256, %s36_s28, [#allocation6], %s1898_s15, %s1898_s15, %s1899_s16  }
  0x15   :  { %s1900_s19 = smov [#allocation8]   ;;  %s1901_s21 = smov [#allocation2]  }
  0x16   :  { %s59_s20 = sshll.u32 %s1900_s19, 4  ;;  %s23_s22 = sshll.u32 %s1901_s21, 4  ;;  %s60_s20 = int_to_ptr.vmem [resolvable:$true] %s59_s20  ;;  %s24_s22 = int_to_ptr.vmem [resolvable:$true] %s23_s22 }
  0x17   :  { %s1755_s25 = scalar_lea.hbm %s2285_s3, 1024 }
  0x18   :  { %p1756_p8 = scmp.ne.s32.totalorder %s2285_s3, %s1755_s25  ;;  %p1759_p9 = scmp.lt.u32.totalorder %s1755_s25, %s2285_s3 }
  0x1a   :  { %p1761_p10 = pnand %p1759_p9, %p1756_p8 }
  0x1c   :  { %1764 = shalt.err (!%p1761_p10)
}
  0x1d   :  { %s1765_s1 = scalar_lea.vmem %s60_s20, 1024  ;;  %p1770_p12 = scmp.lt.s32.totalorder %s60_s20, %s60_s20 }
  0x1e   :  { %p1766_p11 = scmp.ne.s32.totalorder %s60_s20, %s1765_s1  ;;  %p1771_p13 = scmp.lt.s32.totalorder %s1765_s1, %s1765_s1 }
  0x20   :  { %p1772_p0 = por %p1771_p13, %p1770_p12 }
  0x22   :  { %p1773_p1 = pnand %p1772_p0, %p1766_p11 }
  0x24   :  { %1776 = shalt.err (!%p1773_p1)
}
  0x25   :  { %65 = dma.hbm_to_vmem [thread:$0]  %s2285_s3, 1024, %s60_s20, [#allocation9], %s1898_s15, %s1898_s15, %s1899_s16  }
  0x26   :  { %s1777_s12 = scalar_lea.hbm %s2282_s0, 512 }
  0x27   :  { %p1778_p2 = scmp.ne.s32.totalorder %s2282_s0, %s1777_s12  ;;  %p1781_p3 = scmp.lt.u32.totalorder %s1777_s12, %s2282_s0 }
  0x29   :  { %p1783_p4 = pnand %p1781_p3, %p1778_p2 }
  0x2b   :  { %1786 = shalt.err (!%p1783_p4)
}
  0x2c   :  { %s1787_s19 = scalar_lea.vmem %s24_s22, 512  ;;  %p1792_p6 = scmp.lt.s32.totalorder %s24_s22, %s24_s22 }
  0x2d   :  { %p1788_p5 = scmp.ne.s32.totalorder %s24_s22, %s1787_s19  ;;  %p1793_p7 = scmp.lt.s32.totalorder %s1787_s19, %s1787_s19 }
  0x2f   :  { %p1794_p8 = por %p1793_p7, %p1792_p6 }
  0x31   :  { %p1795_p9 = pnand %p1794_p8, %p1788_p5 }
  0x33   :  { %1798 = shalt.err (!%p1795_p9)
}
  0x34   :  { %s1902_s3 = smov 128   ;;  %s1903_s20 = smov 8  }
  0x35   :  { %29 = dma.hbm_to_vmem [thread:$0]  %s2282_s0, 512, %s24_s22, [#allocation3], %s1902_s3, %s1902_s3, %s1903_s20  }
  0x36   :  { %s1904_s24 = smov [#allocation7]   ;;  %s1905_s26 = smov [#allocation10]  }
  0x37   :  { %s47_s25 = sshll.u32 %s1904_s24, 4  ;;  %s73_s27 = sshll.u32 %s1905_s26, 4  ;;  %s48_s25 = int_to_ptr.vmem [resolvable:$true] %s47_s25  ;;  %s74_s27 = int_to_ptr.vmem [resolvable:$true] %s73_s27 }
  0x38   :  { %s1799_s1 = scalar_lea.hbm %s2284_s2, 2048 }
  0x39   :  { %p1800_p10 = scmp.ne.s32.totalorder %s2284_s2, %s1799_s1  ;;  %p1803_p11 = scmp.lt.u32.totalorder %s1799_s1, %s2284_s2 }
  0x3b   :  { %p1805_p12 = pnand %p1803_p11, %p1800_p10 }
  0x3d   :  { %1808 = shalt.err (!%p1805_p12)
}
  0x3e   :  { %s1809_s0 = scalar_lea.vmem %s48_s25, 2048  ;;  %p1814_p0 = scmp.lt.s32.totalorder %s48_s25, %s48_s25 }
  0x3f   :  { %p1810_p13 = scmp.ne.s32.totalorder %s48_s25, %s1809_s0  ;;  %p1815_p1 = scmp.lt.s32.totalorder %s1809_s0, %s1809_s0 }
  0x41   :  { %p1816_p2 = por %p1815_p1, %p1814_p0 }
  0x43   :  { %p1817_p3 = pnand %p1816_p2, %p1810_p13 }
  0x45   :  { %1820 = shalt.err (!%p1817_p3)
}
  0x46   :  { %53 = dma.hbm_to_vmem [thread:$0]  %s2284_s2, 2048, %s48_s25, [#allocation6], %s1898_s15, %s1898_s15, %s1899_s16  }
  0x47   :  { %s1821_s17 = scalar_lea.hbm %s2287_s5, 1024 }
  0x48   :  { %p1822_p4 = scmp.ne.s32.totalorder %s2287_s5, %s1821_s17  ;;  %p1825_p5 = scmp.lt.u32.totalorder %s1821_s17, %s2287_s5 }
  0x4a   :  { %p1827_p6 = pnand %p1825_p5, %p1822_p4 }
  0x4c   :  { %1830 = shalt.err (!%p1827_p6)
}
  0x4d   :  { %s1831_s21 = scalar_lea.vmem %s74_s27, 1024  ;;  %p1836_p8 = scmp.lt.s32.totalorder %s74_s27, %s74_s27 }
  0x4e   :  { %p1832_p7 = scmp.ne.s32.totalorder %s74_s27, %s1831_s21  ;;  %p1837_p9 = scmp.lt.s32.totalorder %s1831_s21, %s1831_s21 }
  0x50   :  { %p1838_p10 = por %p1837_p9, %p1836_p8 }
  0x52   :  { %p1839_p11 = pnand %p1838_p10, %p1832_p7 }
  0x54   :  { %1842 = shalt.err (!%p1839_p11)
}
  0x55   :  { %79 = dma.hbm_to_vmem [thread:$0]  %s2287_s5, 1024, %s74_s27, [#allocation9], %s1898_s15, %s1898_s15, %s1899_s16  }
  0x56   :  { %s1906_s24 = smov [#allocation11]   ;;  %s1843_s30 = scalar_lea.hbm %s2288_s6, 1024 }
  0x57   :  { %s85_s25 = sshll.u32 %s1906_s24, 4  ;;  %p1844_p12 = scmp.ne.s32.totalorder %s2288_s6, %s1843_s30  ;;  %s86_s25 = int_to_ptr.vmem [resolvable:$true] %s85_s25 }
  0x58   :  { %p1847_p13 = scmp.lt.u32.totalorder %s1843_s30, %s2288_s6 }
  0x5a   :  { %p1849_p0 = pnand %p1847_p13, %p1844_p12 }
  0x5c   :  { %1852 = shalt.err (!%p1849_p0)
}
  0x5d   :  { %s1853_s11 = scalar_lea.vmem %s86_s25, 1024  ;;  %p1858_p2 = scmp.lt.s32.totalorder %s86_s25, %s86_s25 }
  0x5e   :  { %p1854_p1 = scmp.ne.s32.totalorder %s86_s25, %s1853_s11  ;;  %p1859_p3 = scmp.lt.s32.totalorder %s1853_s11, %s1853_s11 }
  0x60   :  { %p1860_p4 = por %p1859_p3, %p1858_p2 }
  0x62   :  { %p1861_p5 = pnand %p1860_p4, %p1854_p1 }
  0x64   :  { %1864 = shalt.err (!%p1861_p5)
}
  0x65   :  { %91 = dma.hbm_to_vmem [thread:$0]  %s2288_s6, 1024, %s86_s25, [#allocation12], %s1898_s15, %s1898_s15, %s1899_s16  }
  0x66   :  { %1887 = dma.done.wait [#allocation3], 512  }
  0x67   :  { %1888 = vsyncadd [#allocation3], 4294966784 }
  0x68   :  { %1889 = dma.done.wait [#allocation6], 2304  }
  0x69   :  { %1890 = vsyncadd [#allocation6], 4294964992 }
  0x6a   :  { %1891 = dma.done.wait [#allocation9], 2048  }
  0x6b   :  { %1892 = vsyncadd [#allocation9], 4294965248 }
  0x6c   :  { %1893 = dma.done.wait [#allocation12], 1024  }
  0x6d   :  { %1894 = vsyncadd [#allocation12], 4294966272  ;;  %v1611_v0 = vld [vmem:[#allocation7 + $0x40] sm:$0xff]   ;;  %v1613_v2 = vld [vmem:[#allocation7 + $0x48] sm:$0xff]   ;;  %v166_v39 = vlaneseq  ;;  %vm1151_vm0 = vcmask 261120   ;;  %vm1318_vm1 = vcmask 0  }
  0x6e   :  { %v1612_v1 = vld [vmem:[#allocation7] sm:$0xff]   ;;  %1384 = vmatprep.subr.bf16.mxu0 %v1611_v0  ;;  %v1614_v3 = vld [vmem:[#allocation7 + $0x8] sm:$0xff]   ;;  %v1615_v4 = vld [vmem:[#allocation7 + $0x50] sm:$0xff]  }
  0x6f   :  { %1385 = vmatpush3.bf16.msra.mxu0 %v1612_v1  ;;  %v1616_v5 = vld [vmem:[#allocation7 + $0x10] sm:$0xff]   ;;  %v1617_v6 = vld [vmem:[#allocation7 + $0x58] sm:$0xff]   ;;  %v1619_v8 = vld [vmem:[#allocation7 + $0x60] sm:$0xff]   ;;  %v2043_v40 = vshrl.u32 %v166_v39, 7 }
  0x70   :  { %1386 = vmatprep.subr.bf16.mxu0 %v1613_v2  ;;  %v1618_v7 = vld [vmem:[#allocation7 + $0x18] sm:$0xff]   ;;  %v1620_v9 = vld [vmem:[#allocation7 + $0x20] sm:$0xff]   ;;  %v1621_v10 = vld [vmem:[#allocation7 + $0x68] sm:$0xff]  }
  0x71   :  { %v1629_v11 = vld [vmem:[#allocation2 + $0x4] ss:$8 sps:$4 sm:$0xff]   ;;  %v1622_v12 = vld [vmem:[#allocation7 + $0x28] sm:$0xff]   ;;  %v1627_v17 = vld [vmem:[#allocation2] ss:$8 sps:$4 sm:$0xff]   ;;  %v168_v41 = vsub.s32 0, %v2043_v40 }
  0x72   :  { %318 = vmatprep.mubr.bf16.mxu0 %v1629_v11  ;;  %v1623_v13 = vld [vmem:[#allocation7 + $0x70] sm:$0xff]   ;;  %v1625_v15 = vld [vmem:[#allocation7 + $0x78] sm:$0xff]   ;;  %v1630_v18 = vld [vmem:[#allocation10] sm:$0xff]  }
  0x73   :  { %1387 = vmatpush3.bf16.msra.mxu0 %v1614_v3  ;;  %v1624_v14 = vld [vmem:[#allocation7 + $0x30] sm:$0xff]   ;;  %v1626_v16 = vld [vmem:[#allocation7 + $0x38] sm:$0xff]   ;;  %v1632_v19 = vld [vmem:[#allocation2 + $0x14] ss:$8 sps:$4 sm:$0xff]  }
  0x74   :  { %1388 = vmatprep.subr.bf16.mxu0 %v1615_v4  ;;  %v1631_v20 = vld [vmem:[#allocation10 + $0x8] sm:$0xff]   ;;  %v1635_v21 = vld [vmem:[#allocation10 + $0x10] sm:$0xff]   ;;  %v1636_v24 = vld [vmem:[#allocation10 + $0x18] sm:$0xff]  }
  0x75   :  { %v1634_v22 = vld [vmem:[#allocation2 + $0x10] ss:$8 sps:$4 sm:$0xff]   ;;  %v1641_v23 = vld [vmem:[#allocation5] sm:$0xff]   ;;  %v1640_v28 = vld [vmem:[#allocation10 + $0x38] sm:$0xff]  }
  0x76   :  { %v1637_v25 = vld [vmem:[#allocation10 + $0x20] sm:$0xff]   ;;  %v1638_v26 = vld [vmem:[#allocation10 + $0x28] sm:$0xff]   ;;  %v1639_v27 = vld [vmem:[#allocation10 + $0x30] sm:$0xff]  }
  0x77   :  { %1389 = vmatpush3.bf16.msra.mxu0 %v1616_v5  ;;  %v1642_v29 = vld [vmem:[#allocation5 + $0x8] sm:$0xff]   ;;  %v1643_v30 = vld [vmem:[#allocation8] sm:$0xff]   ;;  %v1644_v31 = vld [vmem:[#allocation8 + $0x8] sm:$0xff]  }
  0x78   :  { %1390 = vmatprep.subr.bf16.mxu0 %v1617_v6  ;;  %1466 = vmatprep.subr.bf16.mxu1 %v1643_v30  ;;  %v1645_v32 = vld [vmem:[#allocation8 + $0x10] sm:$0xff]   ;;  %v1646_v33 = vld [vmem:[#allocation8 + $0x18] sm:$0xff]   ;;  %v1647_v34 = vld [vmem:[#allocation8 + $0x20] sm:$0xff]  }
  0x79   :  { %1467 = vmatpush3.bf16.msra.mxu1 %v1643_v30  ;;  %v1648_v35 = vld [vmem:[#allocation8 + $0x28] sm:$0xff]   ;;  %v1649_v36 = vld [vmem:[#allocation8 + $0x30] sm:$0xff]   ;;  %v1650_v37 = vld [vmem:[#allocation8 + $0x38] sm:$0xff]  }
  0x7a   :  { %1468 = vmatprep.subr.bf16.mxu1 %v1644_v31  ;;  %v2040_v38 = vld [vmem:[#allocation11] sm:$0xff]   ;;  %v2049_v42 = vld [vmem:[%s2286_s4] sm:$0xff] }
  0x7b   :  { %1391 = vmatpush3.bf16.msra.mxu0 %v1618_v7  ;;  %v169_v44 = vrot.slane %v2049_v42, %v168_v41 }
  0x7c   :  { %1392 = vmatprep.subr.bf16.mxu0 %v1619_v8 }
  0x7d   :  { %1469 = vmatpush3.bf16.msra.mxu1 %v1644_v31 }
  0x7e   :  { %1470 = vmatprep.subr.bf16.mxu1 %v1645_v32 }
  0x7f   :  { %1393 = vmatpush3.bf16.msra.mxu0 %v1620_v9 }
  0x80   :  { %1394 = vmatprep.subr.bf16.mxu0 %v1621_v10 }
  0x81   :  { %1471 = vmatpush3.bf16.msra.mxu1 %v1645_v32 }
  0x82   :  { %1472 = vmatprep.subr.bf16.mxu1 %v1646_v33 }
  0x83   :  { %1395 = vmatpush3.bf16.msra.mxu0 %v1622_v12 }
  0x84   :  { %1396 = vmatprep.subr.bf16.mxu0 %v1623_v13 }
  0x85   :  { %1473 = vmatpush3.bf16.msra.mxu1 %v1646_v33 }
  0x86   :  { %1474 = vmatprep.subr.bf16.mxu1 %v1647_v34 }
  0x87   :  { %1397 = vmatpush3.bf16.msra.mxu0 %v1624_v14 }
  0x88   :  { %1398 = vmatprep.subr.bf16.mxu0 %v1625_v15 }
  0x89   :  { %1475 = vmatpush3.bf16.msra.mxu1 %v1647_v34 }
  0x8a   :  { %1476 = vmatprep.subr.bf16.mxu1 %v1648_v35 }
  0x8b   :  { %1399 = vmatpush3.bf16.msra.mxu0 %v1626_v16 }
  0x8c   :  { %1486 = vmatprep.subr.bf16.mxu0 %v1630_v18 }
  0x8d   :  { %1477 = vmatpush3.bf16.msra.mxu1 %v1648_v35 }
  0x8e   :  { %319 = vmatmul.mubr.bf16.vlgmr.msra.gmra.mrb[0].mxu0 %v1627_v17  ;;  %1478 = vmatprep.subr.bf16.mxu1 %v1649_v36  ;;  %v2079_v17 = vld [vmem:[%s2289_s7] sm:$0xff]  ;;  %s1907_s7 = smov [#allocation13]  }
  0x8f   :  { %1487 = vmatpush3.bf16.msra.mxu0 %v1630_v18  ;;  %326 = vmatprep.mubr.bf16.mxu0 %v1632_v19  ;;  %s1326_s0 = sshll.u32 %s1907_s7, 4  ;;  %s1327_s0 = int_to_ptr.vmem [resolvable:$true] %s1326_s0 }
  0x90   :  { %1488 = vmatprep.subr.bf16.mxu0 %v1631_v20  ;;  %s1865_s22 = scalar_lea.vmem %s1327_s0, 16  ;;  %s1869_s12 = scalar_lea.vmem %s1327_s0, 32 }
  0x91   :  { %1479 = vmatpush3.bf16.msra.mxu1 %v1649_v36  ;;  %p1866_p6 = scmp.ne.s32.totalorder %s1327_s0, %s1865_s22  ;;  %p1870_p7 = scmp.lt.s32.totalorder %s1327_s0, %s1327_s0 }
  0x92   :  { %1480 = vmatprep.subr.bf16.mxu1 %v1650_v37  ;;  %p1871_p8 = scmp.lt.s32.totalorder %s1869_s12, %s1865_s22 }
  0x93   :  { %1489 = vmatpush3.bf16.msra.mxu0 %v1631_v20  ;;  %v579_v20 = vrot.slane %v2079_v17, %v168_v41 }
  0x94   :  { %1490 = vmatprep.subr.bf16.mxu0 %v1635_v21  ;;  %p1872_p9 = por %p1871_p8, %p1870_p7 }
  0x95   :  { %1481 = vmatpush3.bf16.msra.mxu1 %v1650_v37 }
  0x96   :  { %327 = vmatmul.mubr.bf16.gmra.mrb[4].mxu0 %v1634_v22  ;;  %1506 = vmatprep.subr.bf16.mxu1 %v2040_v38  ;;  %p1873_p10 = pnand %p1872_p9, %p1866_p6 }
  0x97   :  { %1491 = vmatpush3.bf16.msra.mxu0 %v1635_v21  ;;  %1502 = vmatprep.mubr.bf16.mxu0 %v1641_v23 }
  0x98   :  { %1492 = vmatprep.subr.bf16.mxu0 %v1636_v24 }
  0x9b   :  { %1493 = vmatpush3.bf16.msra.mxu0 %v1636_v24 }
  0x9c   :  { %1494 = vmatprep.subr.bf16.mxu0 %v1637_v25 }
  0x9f   :  { %1495 = vmatpush3.bf16.msra.mxu0 %v1637_v25 }
  0xa0   :  { %1496 = vmatprep.subr.bf16.mxu0 %v1638_v26 }
  0xa3   :  { %1497 = vmatpush3.bf16.msra.mxu0 %v1638_v26 }
  0xa4   :  { %1498 = vmatprep.subr.bf16.mxu0 %v1639_v27 }
  0xa7   :  { %1499 = vmatpush3.bf16.msra.mxu0 %v1639_v27 }
  0xa8   :  { %1500 = vmatprep.subr.bf16.mxu0 %v1640_v28 }
  0xab   :  { %1501 = vmatpush3.bf16.msra.mxu0 %v1640_v28 }
  0xae   :  { %1503 = vmatmul.mubr.bf16.vlgmr.msra.gmra.mrb[8].mxu0 %v1642_v29 }
 0x161   :  { %v1400_v43 = vpop.f32.mrb[0].mxu0 }
 0x162   :  { %v1401_v45 = vpop.f32.mrb[1].mxu0 }
 0x163   :  { %v1402_v46 = vadd.f32 %v1401_v45, %v1400_v43  ;;  %v1403_v47 = vpop.f32.mrb[2].mxu0 }
 0x164   :  { %v1404_v48 = vpop.f32.mrb[3].mxu0 }
 0x165   :  { %v2052_v49 = vadd.f32 %v1402_v46, %v169_v44  ;;  %v1405_v50 = vadd.f32 %v1404_v48, %v1403_v47 }
 0x167   :  { %v2054_v51 = vadd.f32 %v1405_v50, %v169_v44  ;;  %v339_v52 = vmul.f32 0.044715, %v2052_v49  ;;  %v335_v21 = vmul.f32 0.5, %v2052_v49 }
 0x169   :  { %v1406_v53 = vpop.f32.mrb[4].mxu0  ;;  %v340_v54 = vmul.f32 0.044715, %v2054_v51  ;;  %v343_v55 = vmul.f32 %v339_v52, %v2052_v49  ;;  %v336_v22 = vmul.f32 0.5, %v2054_v51 }
 0x16a   :  { %v1407_v56 = vpop.f32.mrb[5].mxu0 }
 0x16b   :  { %v1408_v57 = vadd.f32 %v1407_v56, %v1406_v53  ;;  %v1409_v58 = vpop.f32.mrb[6].mxu0  ;;  %v344_v59 = vmul.f32 %v340_v54, %v2054_v51  ;;  %v347_v60 = vmul.f32 %v343_v55, %v2052_v49 }
 0x16c   :  { %v1410_v61 = vpop.f32.mrb[7].mxu0 }
 0x16d   :  { %v2061_v62 = vadd.f32 %v1408_v57, %v169_v44  ;;  %v1411_v63 = vadd.f32 %v1410_v61, %v1409_v58  ;;  %v348_v0 = vmul.f32 %v344_v59, %v2054_v51  ;;  %v351_v1 = vadd.f32 %v347_v60, %v2052_v49  ;;  %v1652_v58 = vld [vmem:[#allocation11 + $0x8] sm:$0xff]  }
 0x16f   :  { %v2065_v2 = vadd.f32 %v1411_v63, %v169_v44  ;;  %v352_v3 = vadd.f32 %v348_v0, %v2054_v51  ;;  %v355_v4 = vmul.f32 0.7978845, %v351_v1  ;;  %v341_v5 = vmul.f32 0.044715, %v2061_v62 }
 0x170   :  { %v337_v44 = vmul.f32 0.5, %v2061_v62 }
 0x171   :  { %v356_v6 = vmul.f32 0.7978845, %v352_v3  ;;  %1659 = vtanh.f32 %v355_v4  ;;  %v342_v7 = vmul.f32 0.044715, %v2065_v2  ;;  %v345_v8 = vmul.f32 %v341_v5, %v2061_v62  ;;  %v1653_v4 = vld [vmem:[#allocation11 + $0x10] sm:$0xff]  }
 0x172   :  { %v338_v45 = vmul.f32 0.5, %v2065_v2 }
 0x173   :  { %1661 = vtanh.f32 %v356_v6  ;;  %v346_v9 = vmul.f32 %v342_v7, %v2065_v2  ;;  %v349_v10 = vmul.f32 %v345_v8, %v2061_v62  ;;  %v1654_v8 = vld [vmem:[#allocation11 + $0x18] sm:$0xff]  }
 0x175   :  { %v350_v11 = vmul.f32 %v346_v9, %v2065_v2  ;;  %v353_v12 = vadd.f32 %v349_v10, %v2061_v62 }
 0x177   :  { %v354_v13 = vadd.f32 %v350_v11, %v2065_v2  ;;  %v357_v14 = vmul.f32 0.7978845, %v353_v12  ;;  %v1656_v11 = vld [vmem:[#allocation11 + $0x28] sm:$0xff]  }
 0x179   :  { %v358_v15 = vmul.f32 0.7978845, %v354_v13  ;;  %1663 = vtanh.f32 %v357_v14 }
 0x17b   :  { %v1660_v16 = vpop.eup %1659  ;;  %1665 = vtanh.f32 %v358_v15 }
 0x17c   :  { %v363_v18 = vadd.f32 1.0, %v1660_v16 }
 0x17d   :  { %v1662_v19 = vpop.eup %1661 }
 0x17e   :  { %v364_v23 = vadd.f32 1.0, %v1662_v19  ;;  %v367_v24 = vmul.f32 %v363_v18, %v335_v21 }
 0x180   :  { %v368_v25 = vmul.f32 %v364_v23, %v336_v22 }
 0x181   :  { %v1504_v26 = vpop.f32.mrb[8].mxu0 }
 0x182   :  { %v2084_v27 = vadd.f32 %v1504_v26, %v579_v20  ;;  %v674_v28 = vpop.f32.mrb[9].mxu0  ;;  %v371_v29 = vpack.c.bf16 %v368_v25, %v367_v24  ;;  %v1658_v24 = vld [vmem:[#allocation11 + $0x38] sm:$0xff]  }
 0x183   :  { %v2086_v30 = vadd.f32 %v674_v28, %v579_v20  ;;  %v1505_v31 = vpop.f32.mrb[10].mxu0  ;;  %v1664_v32 = vpop.eup %1663 }
 0x184   :  { %v695_v33 = vmul.f32 0.044715, %v2084_v27  ;;  %v2089_v34 = vadd.f32 %v1505_v31, %v579_v20  ;;  %1482 = vmatprep.mubr.bf16.mxu1 %v371_v29  ;;  %v677_v35 = vpop.f32.mrb[11].mxu0  ;;  %v365_v39 = vadd.f32 1.0, %v1664_v32  ;;  %v691_v29 = vmul.f32 0.5, %v2084_v27 }
 0x185   :  { %v1666_v36 = vpop.eup %1665  ;;  %v2091_v37 = vadd.f32 %v677_v35, %v579_v20  ;;  %v693_v41 = vmul.f32 0.044715, %v2086_v30  ;;  %v689_v14 = vmul.f32 0.5, %v2086_v30  ;;  %v1657_v20 = vld [vmem:[#allocation11 + $0x30] sm:$0xff]   ;;  %v375_v35 = vsub.s32 1, %v2043_v40 }
 0x186   :  { %v696_v43 = vmul.f32 0.044715, %v2089_v34  ;;  %v366_v46 = vadd.f32 1.0, %v1666_v36  ;;  %v699_v47 = vmul.f32 %v695_v33, %v2084_v27  ;;  %v369_v53 = vmul.f32 %v365_v39, %v337_v44 }
 0x187   :  { %v694_v48 = vmul.f32 0.044715, %v2091_v37  ;;  %v697_v50 = vmul.f32 %v693_v41, %v2086_v30  ;;  %v690_v15 = vmul.f32 0.5, %v2091_v37  ;;  %v692_v26 = vmul.f32 0.5, %v2089_v34 }
 0x188   :  { %v700_v52 = vmul.f32 %v696_v43, %v2089_v34  ;;  %v370_v54 = vmul.f32 %v366_v46, %v338_v45  ;;  %v703_v63 = vmul.f32 %v699_v47, %v2084_v27  ;;  %v376_v36 = vrot.slane %v2049_v42, %v375_v35 }
 0x189   :  { %v698_v55 = vmul.f32 %v694_v48, %v2091_v37  ;;  %v701_v56 = vmul.f32 %v697_v50, %v2086_v30 }
 0x18a   :  { %v372_v57 = vpack.c.bf16 %v370_v54, %v369_v53  ;;  %v704_v59 = vmul.f32 %v700_v52, %v2089_v34  ;;  %v707_v6 = vadd.f32 %v703_v63, %v2084_v27  ;;  %v730_v53 = vrot.slane %v2079_v17, %v375_v35 }
 0x18b   :  { %v702_v60 = vmul.f32 %v698_v55, %v2091_v37  ;;  %v705_v61 = vadd.f32 %v701_v56, %v2086_v30 }
 0x18c   :  { %1483 = vmatmul.mubr.bf16.vlgmr.msra.gmra.mrb[0].mxu1 %v372_v57  ;;  %v708_v3 = vadd.f32 %v704_v59, %v2089_v34  ;;  %v711_v9 = vmul.f32 0.7978845, %v707_v6 }
 0x18d   :  { %1507 = vmatpush3.bf16.msra.mxu1 %v2040_v38  ;;  %v706_v0 = vadd.f32 %v702_v60, %v2091_v37  ;;  %v709_v1 = vmul.f32 0.7978845, %v705_v61  ;;  %v1655_v38 = vld [vmem:[#allocation11 + $0x20] sm:$0xff]  }
 0x18e   :  { %1508 = vmatprep.subr.bf16.mxu1 %v1652_v58  ;;  %v712_v7 = vmul.f32 0.7978845, %v708_v3 }
 0x18f   :  { %v710_v5 = vmul.f32 0.7978845, %v706_v0  ;;  %1667 = vtanh.f32 %v709_v1 }
 0x191   :  { %1509 = vmatpush3.bf16.msra.mxu1 %v1652_v58  ;;  %1669 = vtanh.f32 %v710_v5 }
 0x192   :  { %1510 = vmatprep.subr.bf16.mxu1 %v1653_v4  ;;  %1671 = vtanh.f32 %v712_v7 }
 0x193   :  { %1673 = vtanh.f32 %v711_v9 }
 0x195   :  { %1511 = vmatpush3.bf16.msra.mxu1 %v1653_v4 }
 0x196   :  { %1512 = vmatprep.subr.bf16.mxu1 %v1654_v8 }
 0x199   :  { %v1668_v10 = vpop.eup %1667  ;;  %1513 = vmatpush3.bf16.msra.mxu1 %v1654_v8 }
 0x19a   :  { %1514 = vmatprep.subr.bf16.mxu1 %v1655_v38  ;;  %v717_v12 = vadd.f32 1.0, %v1668_v10 }
 0x19b   :  { %v1670_v13 = vpop.eup %1669 }
 0x19c   :  { %v718_v16 = vadd.f32 1.0, %v1670_v13  ;;  %v721_v18 = vmul.f32 %v717_v12, %v689_v14  ;;  %v1672_v21 = vpop.eup %1671 }
 0x19d   :  { %1515 = vmatpush3.bf16.msra.mxu1 %v1655_v38  ;;  %v1674_v23 = vpop.eup %1673  ;;  %v720_v25 = vadd.f32 1.0, %v1672_v21 }
 0x19e   :  { %1516 = vmatprep.subr.bf16.mxu1 %v1656_v11  ;;  %v722_v19 = vmul.f32 %v718_v16, %v690_v15  ;;  %v719_v28 = vadd.f32 1.0, %v1674_v23 }
 0x19f   :  { %v724_v31 = vmul.f32 %v720_v25, %v692_v26 }
 0x1a0   :  { %v725_v22 = vpack.c.bf16 %v722_v19, %v721_v18  ;;  %v723_v32 = vmul.f32 %v719_v28, %v691_v29 }
 0x1a1   :  { %1517 = vmatpush3.bf16.msra.mxu1 %v1656_v11 }
 0x1a2   :  { %1522 = vmatprep.mubr.bf16.mxu1 %v725_v22  ;;  %1518 = vmatprep.subr.bf16.mxu1 %v1657_v20  ;;  %v726_v33 = vpack.c.bf16 %v724_v31, %v723_v32 }
 0x1a5   :  { %1519 = vmatpush3.bf16.msra.mxu1 %v1657_v20 }
 0x1a6   :  { %1520 = vmatprep.subr.bf16.mxu1 %v1658_v24 }
 0x1a9   :  { %1521 = vmatpush3.bf16.msra.mxu1 %v1658_v24 }
 0x1ac   :  { %1523 = vmatmul.mubr.bf16.vlgmr.msra.gmra.mrb[4].mxu1 %v726_v33 }
 0x25f   :  { %v1484_v39 = vpop.f32.mrb[0].mxu1 }
 0x260   :  { %v459_v41 = vpop.f32.mrb[1].mxu1  ;;  %v468_v48 = vadd.f32 %v1484_v39, %v376_v36 }
 0x261   :  { %v460_v43 = vadd.f32 %v459_v41, %v376_v36  ;;  %v1485_v44 = vpop.f32.mrb[2].mxu1 }
 0x262   :  { %v462_v45 = vpop.f32.mrb[3].mxu1  ;;  %v476_v52 = vadd.f32 %v468_v48, %v2061_v62 }
 0x263   :  { %v463_v46 = vadd.f32 %v462_v45, %v376_v36  ;;  %v474_v47 = vadd.f32 %v460_v43, %v2052_v49  ;;  %v525_v43 = vsub.s32 2, %v2043_v40 }
 0x265   :  { %478 = vadd.xlane.f32.xlu0 %v474_v47  ;;  %v475_v50 = vadd.f32 %v463_v46, %v2054_v51  ;;  %v471_v51 = vadd.f32 %v1485_v44, %v376_v36  ;;  %v526_v45 = vrot.slane %v2049_v42, %v525_v43  ;;  %v533_v46 = vsub.s32 3, %v2043_v40 }
 0x267   :  { %v477_v0 = vadd.f32 %v471_v51, %v2065_v2 }
 0x269   :  { %480 = vadd.xlane.f32.xlu0 %v475_v50 }
 0x26d   :  { %482 = vadd.xlane.f32.xlu0 %v476_v52 }
 0x27f   :  { %v1524_v54 = vpop.f32.mrb[4].mxu1 }
 0x280   :  { %v822_v55 = vadd.f32 %v1524_v54, %v730_v53  ;;  %v813_v56 = vpop.f32.mrb[5].mxu1 }
 0x281   :  { %v814_v57 = vadd.f32 %v813_v56, %v730_v53  ;;  %v1525_v58 = vpop.f32.mrb[6].mxu1 }
 0x282   :  { %v816_v59 = vpop.f32.mrb[7].mxu1  ;;  %v830_v60 = vadd.f32 %v822_v55, %v2084_v27  ;;  %v825_v62 = vadd.f32 %v1525_v58, %v730_v53 }
 0x283   :  { %v817_v61 = vadd.f32 %v816_v59, %v730_v53  ;;  %v828_v49 = vadd.f32 %v814_v57, %v2086_v30 }
 0x284   :  { %836 = vadd.xlane.f32.xlu0 %v830_v60  ;;  %v831_v1 = vadd.f32 %v825_v62, %v2089_v34 }
 0x285   :  { %832 = vadd.xlane.f32.xlu1 %v828_v49  ;;  %v829_v63 = vadd.f32 %v817_v61, %v2091_v37 }
 0x289   :  { %834 = vadd.xlane.f32.xlu1 %v829_v63 }
 0x28d   :  { %484 = vadd.xlane.f32.xlu1 %v477_v0 }
 0x291   :  { %838 = vadd.xlane.f32.xlu1 %v831_v1 }
 0x2f2   :  { %v479_v3 = vpop.xlane.xlu0 %478 }
 0x2f3   :  { %v487_v4 = vmul.f32 0.0078125, %v479_v3 }
 0x2f5   :  { %v491_v5 = vsub.f32 %v474_v47, %v487_v4 }
 0x2f6   :  { %v481_v27 = vpop.xlane.xlu0 %480 }
 0x2f7   :  { %v488_v6 = vmul.f32 0.0078125, %v481_v27  ;;  %v495_v7 = vmul.f32 %v491_v5, %v491_v5 }
 0x2f9   :  { %v492_v30 = vsub.f32 %v475_v50, %v488_v6  ;;  %499 = vadd.xlane.f32.xlu0 %v495_v7  ;;  %v534_v50 = vrot.slane %v2049_v42, %v533_v46  ;;  %v879_v7 = vrot.slane %v2079_v17, %v525_v43 }
 0x2fa   :  { %v483_v9 = vpop.xlane.xlu0 %482 }
 0x2fb   :  { %v496_v8 = vmul.f32 %v492_v30, %v492_v30  ;;  %v489_v38 = vmul.f32 0.0078125, %v483_v9 }
 0x2fd   :  { %501 = vadd.xlane.f32.xlu1 %v496_v8  ;;  %v2128_v34 = vsub.f32 %v476_v52, %v489_v38 }
 0x2ff   :  { %v497_v22 = vmul.f32 %v2128_v34, %v2128_v34 }
 0x311   :  { %v837_v11 = vpop.xlane.xlu0 %836 }
 0x312   :  { %v833_v37 = vpop.xlane.xlu1 %832  ;;  %v842_v13 = vmul.f32 0.0078125, %v837_v11 }
 0x313   :  { %v840_v10 = vmul.f32 0.0078125, %v833_v37  ;;  %v887_v37 = vrot.slane %v2079_v17, %v533_v46 }
 0x314   :  { %v2134_v19 = vsub.f32 %v830_v60, %v842_v13 }
 0x315   :  { %v2126_v2 = vsub.f32 %v828_v49, %v840_v10 }
 0x316   :  { %v835_v12 = vpop.xlane.xlu1 %834  ;;  %v850_v28 = vmul.f32 %v2134_v19, %v2134_v19 }
 0x317   :  { %v841_v14 = vmul.f32 0.0078125, %v835_v12  ;;  %v848_v15 = vmul.f32 %v2126_v2, %v2126_v2 }
 0x319   :  { %v2132_v16 = vsub.f32 %v829_v63, %v841_v14  ;;  %852 = vadd.xlane.f32.xlu0 %v848_v15 }
 0x31a   :  { %v485_v18 = vpop.xlane.xlu1 %484 }
 0x31b   :  { %v490_v20 = vmul.f32 0.0078125, %v485_v18  ;;  %v849_v21 = vmul.f32 %v2132_v16, %v2132_v16 }
 0x31d   :  { %v2140_v23 = vsub.f32 %v477_v0, %v490_v20  ;;  %854 = vadd.xlane.f32.xlu1 %v849_v21  ;;  %503 = vadd.xlane.f32.xlu0 %v497_v22 }
 0x31e   :  { %v839_v24 = vpop.xlane.xlu1 %838 }
 0x31f   :  { %v843_v25 = vmul.f32 0.0078125, %v839_v24  ;;  %v498_v26 = vmul.f32 %v2140_v23, %v2140_v23 }
 0x321   :  { %v2146_v29 = vsub.f32 %v831_v1, %v843_v25  ;;  %505 = vadd.xlane.f32.xlu1 %v498_v26  ;;  %856 = vadd.xlane.f32.xlu0 %v850_v28 }
 0x323   :  { %v851_v31 = vmul.f32 %v2146_v29, %v2146_v29 }
 0x325   :  { %858 = vadd.xlane.f32.xlu1 %v851_v31 }
 0x386   :  { %v500_v32 = vpop.xlane.xlu0 %499 }
 0x387   :  { %v507_v33 = vmul.f32 0.0078125, %v500_v32 }
 0x389   :  { %v511_v35 = vadd.f32 1e-05, %v507_v33 }
 0x38a   :  { %v502_v36 = vpop.xlane.xlu1 %501 }
 0x38b   :  { %1675 = vrsqrt.f32 %v511_v35  ;;  %v508_v39 = vmul.f32 0.0078125, %v502_v36 }
 0x38d   :  { %v512_v41 = vadd.f32 1e-05, %v508_v39 }
 0x38f   :  { %1677 = vrsqrt.f32 %v512_v41 }
 0x395   :  { %v1676_v44 = vpop.eup %1675 }
 0x396   :  { %v519_v47 = vmul.f32 %v1676_v44, %v491_v5 }
 0x398   :  { %v527_v52 = vmul.f32 %v526_v45, %v519_v47 }
 0x399   :  { %v1678_v48 = vpop.eup %1677 }
 0x39a   :  { %v520_v53 = vmul.f32 %v1678_v48, %v492_v30  ;;  %v2154_v55 = vadd.f32 %v534_v50, %v527_v52 }
 0x39c   :  { %v528_v54 = vmul.f32 %v526_v45, %v520_v53 }
 0x39e   :  { %v2156_v56 = vadd.f32 %v534_v50, %v528_v54 }
 0x3a0   :  { %v2160_v57 = vpack.c.bf16 %v2156_v56, %v2154_v55 }
 0x3a2   :  { %1569 = vmatprep.subr.bf16.mxu0 %v2160_v57 }
 0x3a3   :  { %1571 = vmatpush3.bf16.xpose.msra.mxu0 %v2160_v57 }
 0x3a6   :  { %v853_v40 = vpop.xlane.xlu0 %852 }
 0x3a7   :  { %v860_v58 = vmul.f32 0.0078125, %v853_v40 }
 0x3a9   :  { %v864_v59 = vadd.f32 1e-05, %v860_v58 }
 0x3aa   :  { %v855_v60 = vpop.xlane.xlu1 %854  ;;  %v504_v42 = vpop.xlane.xlu0 %503 }
 0x3ab   :  { %1679 = vrsqrt.f32 %v864_v59  ;;  %v861_v61 = vmul.f32 0.0078125, %v855_v60  ;;  %v509_v49 = vmul.f32 0.0078125, %v504_v42 }
 0x3ad   :  { %v865_v51 = vadd.f32 1e-05, %v861_v61  ;;  %v513_v63 = vadd.f32 1e-05, %v509_v49 }
 0x3ae   :  { %v506_v62 = vpop.xlane.xlu1 %505  ;;  %v857_v0 = vpop.xlane.xlu0 %856 }
 0x3af   :  { %1681 = vrsqrt.f32 %v865_v51  ;;  %v510_v1 = vmul.f32 0.0078125, %v506_v62  ;;  %v862_v3 = vmul.f32 0.0078125, %v857_v0 }
 0x3b0   :  { %1683 = vrsqrt.f32 %v513_v63 }
 0x3b1   :  { %v514_v4 = vadd.f32 1e-05, %v510_v1  ;;  %v866_v5 = vadd.f32 1e-05, %v862_v3 }
 0x3b2   :  { %v859_v27 = vpop.xlane.xlu1 %858 }
 0x3b3   :  { %1685 = vrsqrt.f32 %v514_v4  ;;  %v863_v6 = vmul.f32 0.0078125, %v859_v27 }
 0x3b4   :  { %1687 = vrsqrt.f32 %v866_v5 }
 0x3b5   :  { %v1680_v30 = vpop.eup %1679  ;;  %v867_v8 = vadd.f32 1e-05, %v863_v6 }
 0x3b6   :  { %v872_v9 = vmul.f32 %v1680_v30, %v2126_v2 }
 0x3b7   :  { %1689 = vrsqrt.f32 %v867_v8 }
 0x3b8   :  { %v880_v38 = vmul.f32 %v879_v7, %v872_v9 }
 0x3b9   :  { %v1682_v10 = vpop.eup %1681 }
 0x3ba   :  { %v1684_v11 = vpop.eup %1683  ;;  %v888_v12 = vadd.f32 %v887_v37, %v880_v38  ;;  %v873_v13 = vmul.f32 %v1682_v10, %v2132_v16 }
 0x3bb   :  { %v521_v14 = vmul.f32 %v1684_v11, %v2128_v34 }
 0x3bc   :  { %1534 = vmatprep.mubr.f32.mxu0 %v888_v12  ;;  %1548 = vmatprep.mubr.f32.mxu1 %v888_v12  ;;  %v881_v15 = vmul.f32 %v879_v7, %v873_v13 }
 0x3bd   :  { %v1686_v18 = vpop.eup %1685  ;;  %v529_v21 = vmul.f32 %v526_v45, %v521_v14 }
 0x3be   :  { %v1688_v20 = vpop.eup %1687  ;;  %v522_v22 = vmul.f32 %v1686_v18, %v2140_v23  ;;  %v889_v2 = vadd.f32 %v887_v37, %v881_v15 }
 0x3bf   :  { %v874_v17 = vmul.f32 %v1688_v20, %v2134_v19  ;;  %v537_v28 = vadd.f32 %v534_v50, %v529_v21 }
 0x3c0   :  { %v530_v24 = vmul.f32 %v526_v45, %v522_v22  ;;  %v1576_v25 = vpack.c.bf16 %v889_v2, %v888_v12 }
 0x3c1   :  { %v1690_v26 = vpop.eup %1689  ;;  %v882_v34 = vmul.f32 %v879_v7, %v874_v17 }
 0x3c2   :  { %v538_v31 = vadd.f32 %v534_v50, %v530_v24  ;;  %1577 = vmatprep.subr.bf16.mxu1 %v1576_v25  ;;  %v875_v16 = vmul.f32 %v1690_v26, %v2146_v29 }
 0x3c3   :  { %1579 = vmatpush3.bf16.xpose.msra.mxu1 %v1576_v25  ;;  %v890_v35 = vadd.f32 %v887_v37, %v882_v34 }
 0x3c4   :  { %v1572_v32 = vpack.c.bf16 %v538_v31, %v537_v28  ;;  %v883_v33 = vmul.f32 %v879_v7, %v875_v16 }
 0x3c6   :  { %1573 = vmatprep.subr.bf16.mxu0 %v1572_v32  ;;  %v891_v36 = vadd.f32 %v887_v37, %v883_v33 }
 0x3c7   :  { %1575 = vmatpush3.bf16.xpose.msra.mxu0 %v1572_v32 }
 0x3c8   :  { %1585 = vmatprep.subr.bf16.mxu0 %v2160_v57  ;;  %v1580_v23 = vpack.c.bf16 %v891_v36, %v890_v35 }
 0x3ca   :  { %1581 = vmatprep.subr.bf16.mxu1 %v1580_v23 }
 0x3cb   :  { %1583 = vmatpush3.bf16.xpose.msra.mxu1 %v1580_v23 }
 0x3cc   :  { %1592 = vmatprep.subr.bf16.mxu1 %v2160_v57 }
 0x3ce   :  { %1535 = vmatmul.mubr.f32.vlgmr.msra.gmra.mrb[12].mxu0 %v889_v2 }
 0x3cf   :  { %1537 = vmatprep.mubr.f32.mxu0 %v890_v35  ;;  %1587 = vmatpush3.bf16.xpose.msra.mxu0 %v2160_v57 }
 0x3d0   :  { %1589 = vmatprep.subr.bf16.mxu0 %v1572_v32 }
 0x3d2   :  { %1538 = vmatmul.mubr.f32.gmra.mrb[14].mxu0 %v891_v36  ;;  %1549 = vmatmul.mubr.f32.vlgmr.msra.gmra.mrb[8].mxu1 %v889_v2 }
 0x3d3   :  { %1551 = vmatprep.mubr.f32.mxu1 %v890_v35  ;;  %1594 = vmatpush3.bf16.xpose.msra.mxu1 %v2160_v57 }
 0x3d4   :  { %1562 = vmatprep.mubr.f32.mxu0 %v2154_v55  ;;  %1593 = vmatprep.subr.bf16.mxu1 %v1572_v32 }
 0x3d6   :  { %1552 = vmatmul.mubr.f32.gmra.mrb[10].mxu1 %v891_v36 }
 0x3d7   :  { %1591 = vmatpush3.bf16.xpose.msra.mxu0 %v1572_v32  ;;  %1565 = vmatprep.mubr.f32.mxu1 %v537_v28 }
 0x3db   :  { %1595 = vmatpush3.bf16.xpose.msra.mxu1 %v1572_v32 }
 0x3de   :  { %1563 = vmatmul.mubr.f32.vlgmr.msra.gmra.mrb[16].mxu0 %v2156_v56 }
 0x3e2   :  { %1566 = vmatmul.mubr.f32.vlgmr.msra.gmra.mrb[10].mxu1 %v538_v31 }
 0x4a1   :  { %v2178_v19 = vpop.f32.mrb[12].mxu0 }
 0x4a2   :  { %v2180_v29 = vpop.f32.mrb[13].mxu0  ;;  %v1199_v39 = vsel %vm1151_vm0, %v2178_v19, -inf }
 0x4a3   :  { %1200 = vmax.xlane.f32.xlu1 %v1199_v39  ;;  %v1196_v41 = vsel %vm1151_vm0, %v2180_v29, -inf }
 0x4a4   :  { %1197 = vmax.xlane.f32.xlu0 %v1196_v41  ;;  %v1212_v43 = vmax.f32 %v1196_v41, %v1199_v39 }
 0x4a5   :  { %v2186_v44 = vpop.f32.mrb[14].mxu0  ;;  %v1550_v45 = vpop.f32.mrb[8].mxu1 }
 0x4a6   :  { %v2188_v46 = vpop.f32.mrb[15].mxu0  ;;  %v1043_v47 = vpop.f32.mrb[9].mxu1  ;;  %v1205_v48 = vsel %vm1151_vm0, %v2186_v44, -inf }
 0x4a7   :  { %1206 = vmax.xlane.f32.xlu1 %v1205_v48  ;;  %v1202_v50 = vsel %vm1151_vm0, %v2188_v46, -inf }
 0x4a8   :  { %1203 = vmax.xlane.f32.xlu0 %v1202_v50  ;;  %v1213_v52 = vmax.f32 %v1202_v50, %v1205_v48 }
 0x4aa   :  { %v1214_v53 = vmax.f32 %v1212_v43, %v1213_v52 }
 0x4ac   :  { %v1215_v54 = vrot.slane %v1214_v53, 4 }
 0x4ae   :  { %v1216_v55 = vmax.f32 %v1214_v53, %v1215_v54 }
 0x4b0   :  { %v1217_v56 = vrot.slane %v1216_v55, 2 }
 0x4b1   :  { %v1564_v57 = vpop.f32.mrb[16].mxu0 }
 0x4b2   :  { %v1218_v40 = vmax.f32 %v1216_v55, %v1217_v56  ;;  %v1134_v58 = vadd.f32 %v1564_v57, %v1550_v45  ;;  %v1128_v59 = vpop.f32.mrb[17].mxu0 }
 0x4b3   :  { %v1129_v60 = vadd.f32 %v1128_v59, %v1043_v47 }
 0x4b4   :  { %v1219_v42 = vrot.slane %v1218_v40, 1  ;;  %v2194_v61 = vmul.f32 0.5, %v1134_v58 }
 0x4b5   :  { %v2196_v49 = vmul.f32 0.5, %v1129_v60  ;;  %v1567_v51 = vpop.f32.mrb[10].mxu1 }
 0x4b6   :  { %v1220_v63 = vmax.f32 %v1218_v40, %v1219_v42  ;;  %v1138_v62 = vpop.f32.mrb[11].mxu1  ;;  %v1155_v0 = vsel %vm1151_vm0, %v2194_v61, -inf  ;;  %v2200_v1 = vmul.f32 0.5, %v1567_v51 }
 0x4b7   :  { %v2202_v3 = vmul.f32 0.5, %v1138_v62  ;;  %1156 = vmax.xlane.f32.xlu0 %v1155_v0  ;;  %v1152_v4 = vsel %vm1151_vm0, %v2196_v49, -inf }
 0x4b8   :  { %v2207_v5 = vsub.f32 %v2180_v29, %v1220_v63  ;;  %v2210_v27 = vsub.f32 %v2188_v46, %v1220_v63  ;;  %v2213_v6 = vsub.f32 %v2186_v44, %v1220_v63  ;;  %1153 = vmax.xlane.f32.xlu1 %v1152_v4  ;;  %v2218_v30 = vsub.f32 %v2178_v19, %v1220_v63 }
 0x4b9   :  { %v1158_v7 = vsel %vm1151_vm0, %v2202_v3, -inf  ;;  %v1161_v37 = vsel %vm1151_vm0, %v2200_v1, -inf }
 0x4ba   :  { %v1261_v8 = vmul.f32 1.442695, %v2207_v5  ;;  %v1265_v9 = vmul.f32 1.442695, %v2210_v27  ;;  %v1263_v38 = vmul.f32 1.442695, %v2218_v30 }
 0x4bb   :  { %1159 = vmax.xlane.f32.xlu0 %v1158_v7  ;;  %v1267_v10 = vmul.f32 1.442695, %v2213_v6 }
 0x4bc   :  { %1691 = vpow2.f32 %v1261_v8  ;;  %1162 = vmax.xlane.f32.xlu1 %v1161_v37 }
 0x4bd   :  { %1693 = vpow2.f32 %v1265_v9 }
 0x4be   :  { %1695 = vpow2.f32 %v1263_v38 }
 0x4bf   :  { %1697 = vpow2.f32 %v1267_v10 }
 0x4c6   :  { %v1692_v11 = vpop.eup %1691 }
 0x4c7   :  { %v1694_v12 = vpop.eup %1693  ;;  %v1269_v13 = vsel %vm1151_vm0, %v1692_v11, 0.0 }
 0x4c8   :  { %v1696_v14 = vpop.eup %1695  ;;  %v1272_v21 = vsel %vm1151_vm0, %v1694_v12, 0.0 }
 0x4c9   :  { %v1270_v15 = vsel %vm1151_vm0, %v1696_v14, 0.0  ;;  %v1698_v18 = vpop.eup %1697 }
 0x4ca   :  { %v1271_v20 = vadd.f32 %v1270_v15, %v1269_v13  ;;  %v1274_v2 = vsel %vm1151_vm0, %v1698_v18, 0.0 }
 0x4cc   :  { %v1273_v22 = vadd.f32 %v1272_v21, %v1271_v20 }
 0x4ce   :  { %v1275_v17 = vadd.f32 %v1274_v2, %v1273_v22 }
 0x530   :  { %v1201_v24 = vpop.xlane.xlu1 %1200 }
 0x531   :  { %v2231_v25 = vsub.f32 %v2178_v19, %v1201_v24  ;;  %v1198_v26 = vpop.xlane.xlu0 %1197 }
 0x532   :  { %v2234_v28 = vsub.f32 %v2180_v29, %v1198_v26 }
 0x533   :  { %v1227_v31 = vmul.f32 1.442695, %v2231_v25 }
 0x534   :  { %v1225_v16 = vmul.f32 1.442695, %v2234_v28  ;;  %v1207_v34 = vpop.xlane.xlu1 %1206 }
 0x535   :  { %1699 = vpow2.f32 %v1227_v31  ;;  %v2239_v32 = vsub.f32 %v2186_v44, %v1207_v34  ;;  %v1204_v33 = vpop.xlane.xlu0 %1203 }
 0x536   :  { %1701 = vpow2.f32 %v1225_v16  ;;  %v2242_v35 = vsub.f32 %v2188_v46, %v1204_v33 }
 0x537   :  { %v1231_v36 = vmul.f32 1.442695, %v2239_v32 }
 0x538   :  { %v1229_v23 = vmul.f32 1.442695, %v2242_v35 }
 0x539   :  { %1703 = vpow2.f32 %v1231_v36 }
 0x53a   :  { %1705 = vpow2.f32 %v1229_v23 }
 0x53f   :  { %v1700_v19 = vpop.eup %1699 }
 0x540   :  { %v1702_v29 = vpop.eup %1701  ;;  %v1236_v39 = vsel %vm1151_vm0, %v1700_v19, 0.0 }
 0x541   :  { %1237 = vadd.xlane.f32.xlu1 %v1236_v39  ;;  %v1233_v41 = vsel %vm1151_vm0, %v1702_v29, 0.0 }
 0x542   :  { %1234 = vadd.xlane.f32.xlu0 %v1233_v41 }
 0x543   :  { %v1704_v43 = vpop.eup %1703 }
 0x544   :  { %v1706_v44 = vpop.eup %1705  ;;  %v1157_v45 = vpop.xlane.xlu0 %1156  ;;  %v1242_v46 = vsel %vm1151_vm0, %v1704_v43, 0.0 }
 0x545   :  { %v1165_v47 = vsub.f32 %v2194_v61, %v1157_v45  ;;  %1243 = vadd.xlane.f32.xlu1 %v1242_v46  ;;  %v1154_v48 = vpop.xlane.xlu1 %1153  ;;  %v1239_v50 = vsel %vm1151_vm0, %v1706_v44, 0.0 }
 0x546   :  { %v1164_v52 = vsub.f32 %v2196_v49, %v1154_v48  ;;  %1240 = vadd.xlane.f32.xlu0 %v1239_v50 }
 0x547   :  { %v1170_v53 = vmul.f32 1.442695, %v1165_v47 }
 0x548   :  { %v1168_v54 = vmul.f32 1.442695, %v1164_v52  ;;  %v1160_v55 = vpop.xlane.xlu0 %1159 }
 0x549   :  { %1707 = vpow2.f32 %v1170_v53  ;;  %v1166_v56 = vsub.f32 %v2202_v3, %v1160_v55  ;;  %v1163_v57 = vpop.xlane.xlu1 %1162 }
 0x54a   :  { %1709 = vpow2.f32 %v1168_v54  ;;  %v1167_v40 = vsub.f32 %v2200_v1, %v1163_v57  ;;  %v1276_v1 = vrot.slane %v1275_v17, 4 }
 0x54b   :  { %v1172_v58 = vmul.f32 1.442695, %v1166_v56 }
 0x54c   :  { %v1174_v59 = vmul.f32 1.442695, %v1167_v40  ;;  %v1277_v3 = vadd.f32 %v1276_v1, %v1275_v17 }
 0x54d   :  { %1711 = vpow2.f32 %v1172_v58 }
 0x54e   :  { %1713 = vpow2.f32 %v1174_v59  ;;  %v1278_v4 = vrot.slane %v1277_v3, 2 }
 0x550   :  { %v1279_v7 = vadd.f32 %v1278_v4, %v1277_v3 }
 0x552   :  { %v1280_v8 = vrot.slane %v1279_v7, 1 }
 0x553   :  { %v1708_v60 = vpop.eup %1707 }
 0x554   :  { %v1710_v42 = vpop.eup %1709  ;;  %v1179_v61 = vsel %vm1151_vm0, %v1708_v60, 0.0  ;;  %v1281_v9 = vadd.f32 %v1280_v8, %v1279_v7 }
 0x555   :  { %1180 = vadd.xlane.f32.xlu0 %v1179_v61  ;;  %v1176_v49 = vsel %vm1151_vm0, %v1710_v42, 0.0 }
 0x556   :  { %1177 = vadd.xlane.f32.xlu1 %v1176_v49 }
 0x557   :  { %v1712_v51 = vpop.eup %1711 }
 0x558   :  { %v1714_v63 = vpop.eup %1713  ;;  %v1182_v62 = vsel %vm1151_vm0, %v1712_v51, 0.0 }
 0x559   :  { %1183 = vadd.xlane.f32.xlu0 %v1182_v62  ;;  %v1185_v0 = vsel %vm1151_vm0, %v1714_v63, 0.0 }
 0x55a   :  { %1186 = vadd.xlane.f32.xlu1 %v1185_v0 }
 0x5ce   :  { %v1238_v37 = vpop.xlane.xlu1 %1237 }
 0x5cf   :  { %1715 = vlog2.f32 %v1238_v37  ;;  %v1235_v38 = vpop.xlane.xlu0 %1234 }
 0x5d0   :  { %1717 = vlog2.f32 %v1235_v38 }
 0x5d1   :  { %1719 = vlog2.f32 %v1281_v9 }
 0x5d2   :  { %v1244_v10 = vpop.xlane.xlu1 %1243 }
 0x5d3   :  { %1721 = vlog2.f32 %v1244_v10  ;;  %v1241_v11 = vpop.xlane.xlu0 %1240 }
 0x5d4   :  { %1723 = vlog2.f32 %v1241_v11 }
 0x5d9   :  { %v1716_v12 = vpop.eup %1715 }
 0x5da   :  { %v1718_v13 = vpop.eup %1717  ;;  %v1248_v14 = vmul.f32 0.6931472, %v1716_v12 }
 0x5db   :  { %v1720_v15 = vpop.eup %1719  ;;  %v1246_v18 = vmul.f32 0.6931472, %v1718_v13 }
 0x5dc   :  { %v1254_v20 = vsub.f32 %v2231_v25, %v1248_v14  ;;  %v1283_v26 = vmul.f32 0.6931472, %v1720_v15 }
 0x5dd   :  { %v1722_v21 = vpop.eup %1721  ;;  %v1253_v22 = vsub.f32 %v2234_v28, %v1246_v18 }
 0x5de   :  { %v1724_v2 = vpop.eup %1723  ;;  %v1252_v17 = vmul.f32 0.6931472, %v1722_v21  ;;  %v1258_v24 = vadd.f32 %v1254_v20, %v2218_v30 }
 0x5df   :  { %v1250_v31 = vmul.f32 0.6931472, %v1724_v2  ;;  %v1257_v16 = vadd.f32 %v1253_v22, %v2207_v5 }
 0x5e0   :  { %v1256_v34 = vsub.f32 %v2239_v32, %v1252_v17  ;;  %v1285_v33 = vsub.f32 %v1258_v24, %v1283_v26 }
 0x5e1   :  { %v1255_v36 = vsub.f32 %v2242_v35, %v1250_v31  ;;  %v1284_v23 = vsub.f32 %v1257_v16, %v1283_v26 }
 0x5e2   :  { %v1181_v19 = vpop.xlane.xlu0 %1180  ;;  %v1260_v25 = vadd.f32 %v1256_v34, %v2213_v6 }
 0x5e3   :  { %1725 = vrcp.f32 %v1181_v19  ;;  %v1178_v29 = vpop.xlane.xlu1 %1177  ;;  %v1259_v28 = vadd.f32 %v1255_v36, %v2210_v27 }
 0x5e4   :  { %1727 = vrcp.f32 %v1178_v29  ;;  %v1287_v39 = vsub.f32 %v1260_v25, %v1283_v26 }
 0x5e5   :  { %v1286_v30 = vsub.f32 %v1259_v28, %v1283_v26 }
 0x5e6   :  { %v1184_v41 = vpop.xlane.xlu0 %1183 }
 0x5e7   :  { %1729 = vrcp.f32 %v1184_v41  ;;  %v1187_v43 = vpop.xlane.xlu1 %1186 }
 0x5e8   :  { %1731 = vrcp.f32 %v1187_v43 }
 0x5ed   :  { %v1726_v5 = vpop.eup %1725 }
 0x5ee   :  { %v1728_v32 = vpop.eup %1727  ;;  %v1193_v44 = vmul.f32 %v1726_v5, %v1708_v60 }
 0x5ef   :  { %v1192_v45 = vmul.f32 %v1728_v32, %v1710_v42 }
 0x5f0   :  { %v1289_v35 = vsub.f32 0.0, %v1193_v44 }
 0x5f1   :  { %v1730_v46 = vpop.eup %1729  ;;  %v1288_v47 = vsub.f32 0.0, %v1192_v45 }
 0x5f2   :  { %v1732_v48 = vpop.eup %1731  ;;  %v1293_v6 = vmul.f32 %v1289_v35, %v1285_v33  ;;  %v1194_v50 = vmul.f32 %v1730_v46, %v1712_v51 }
 0x5f3   :  { %v1292_v52 = vmul.f32 %v1288_v47, %v1284_v23  ;;  %v1195_v53 = vmul.f32 %v1732_v48, %v1714_v63 }
 0x5f4   :  { %v1299_v27 = vsel %vm1151_vm0, %v1293_v6, 0.0  ;;  %v1290_v54 = vsub.f32 0.0, %v1194_v50 }
 0x5f5   :  { %1300 = vadd.xlane.f32.xlu1 %v1299_v27  ;;  %v1296_v55 = vsel %vm1151_vm0, %v1292_v52, 0.0  ;;  %v1291_v56 = vsub.f32 0.0, %v1195_v53 }
 0x5f6   :  { %1297 = vadd.xlane.f32.xlu0 %v1296_v55  ;;  %v1294_v57 = vmul.f32 %v1290_v54, %v1286_v30 }
 0x5f7   :  { %v1295_v40 = vmul.f32 %v1291_v56, %v1287_v39 }
 0x5f8   :  { %v1302_v58 = vsel %vm1151_vm0, %v1294_v57, 0.0 }
 0x5f9   :  { %v1305_v59 = vsel %vm1151_vm0, %v1295_v40, 0.0 }
 0x5fa   :  { %1306 = vadd.xlane.f32.xlu1 %v1305_v59  ;;  %1303 = vadd.xlane.f32.xlu0 %v1302_v58 }
 0x682   :  { %v1301_v60 = vpop.xlane.xlu1 %1300 }
 0x683   :  { %v1298_v42 = vpop.xlane.xlu0 %1297 }
 0x684   :  { %v1308_v61 = vadd.f32 %v1301_v60, %v1298_v42 }
 0x687   :  { %v1304_v49 = vpop.xlane.xlu0 %1303  ;;  %v1307_v63 = vpop.xlane.xlu1 %1306 }
 0x688   :  { %v1309_v51 = vadd.f32 %v1308_v61, %v1304_v49 }
 0x68a   :  { %v1310_v62 = vadd.f32 %v1309_v51, %v1307_v63 }
 0x68c   :  { %v1311_v0 = vrot.slane %v1310_v62, 4 }
 0x68e   :  { %v1312_v1 = vadd.f32 %v1311_v0, %v1310_v62 }
 0x690   :  { %v1313_v3 = vrot.slane %v1312_v1, 2 }
 0x692   :  { %v1314_v4 = vadd.f32 %v1313_v3, %v1312_v1 }
 0x694   :  { %v1315_v7 = vrot.slane %v1314_v4, 1 }
 0x696   :  { %v1316_v8 = vadd.f32 %v1315_v7, %v1314_v4 }
 0x698   :  { %v1317_v9 = vmul.f32 0.015625, %v1316_v8 }
 0x69a   :  { %1319 = vst.msk [vmem:[#allocation13] sm:$0x1] %vm1318_vm1, %v1317_v9 }
 0x69b   :  { %1876 = shalt.err (!%p1873_p10)
}
 0x69c   :  { %s1877_s17 = scalar_lea.hbm %s2290_s8, 16 }
 0x69d   :  { %p1878_p11 = scmp.ne.s32.totalorder %s2290_s8, %s1877_s17  ;;  %p1881_p12 = scmp.lt.u32.totalorder %s1877_s17, %s2290_s8 }
 0x69f   :  { %p1883_p13 = pnand %p1881_p12, %p1878_p11 }
 0x6a1   :  { %1886 = shalt.err (!%p1883_p13)
}
 0x6a2   :  { %1329 = dma.vmem_to_hbm [thread:$0]  %s1327_s0, 16, %s2290_s8, [#allocation4]  }
 0x6a3   :  { %1895 = dma.done.wait [#allocation4], 16  }
 0x6a4   :  { %1896 = vsyncadd [#allocation4], 4294967280 }
 0x6a5   :  { %1333 = vsyncpa [#allocation3], 1 }
 0x6a6   :  { %1334 = vsyncpa [#allocation6], 1 }
 0x6a7   :  { %1335 = vsyncpa [#allocation9], 1 }
 0x6a8   :  { %1336 = vsyncpa [#allocation12], 1 }
 0x6a9   :  { %1337 = vsyncpa [#allocation4], 1 }

</bundles_post_ra>
